<compile_context>
chip_gen: v7x
topology: tpu7x:2x2x1
jax: 0.10.0
libtpu: 0.0.40
codegen_flags: <defaults>
</compile_context>

<pallas_src>
import jax
import jax.numpy as jnp
from jax.experimental import pallas as pl
from jax.experimental.pallas import tpu as pltpu


NUM_CLASSES = 10
OUT_PAD = 128          # lane-dense padded output width
POOL = 4               # 4x4 average pool


def _round_up(a, b):
    return (a + b - 1) // b * b


def _sublane(dtype):
    # second-to-last block dim granularity by itemsize
    return {4: 8, 2: 16, 1: 32}[jnp.dtype(dtype).itemsize]


def _choose_k_tile(K, k_max):
    """Largest chunk that divides K exactly, is a multiple of 128 (lane width)
    and is <= k_max.  Falls back to the full K extent (always a legal block)."""
    if K <= k_max:
        return K
    d = (k_max // 128) * 128
    while d >= 128:
        if K % d == 0:
            return d
        d -= 128
    return K


def _default_vmem_budget():
    """~70% of this generation's per-core VMEM (v7x: 64 MiB, v5e/v6e: 128 MiB)."""
    try:
        cap = pltpu.get_tpu_info().vmem_capacity_bytes
    except Exception:
        cap = 64 << 20          # most restrictive (v7x) if the query fails
    return int(cap * 0.70)


# --------------------------------------------------------------------------
# Kernel
# --------------------------------------------------------------------------
def _dpn_output_kernel(x_ref, w_ref, b_ref, o_ref):
    # x_ref : (TN, KT)        -- streamed (batch, K) tile of the flattened input
    # w_ref : (K, 128)        -- fully resident fused pool+linear weight
    # b_ref : (1, 128) f32    -- resident padded bias
    # o_ref : (TN, 128) f32   -- resident across the K axis; used as accumulator
    k = pl.program_id(1)
    k_tile = x_ref.shape[1]

    @pl.when(k == 0)
    def _():
        o_ref[...] = jnp.broadcast_to(b_ref[...], o_ref.shape)

    start = k * k_tile
    if k_tile % 128 == 0:
        start = pl.multiple_of(start, 128)

    o_ref[...] += jnp.dot(x_ref[...], w_ref[pl.ds(start, k_tile), :],
                          preferred_element_type=jnp.float32)


# --------------------------------------------------------------------------
# One-time parameter preparation (call at init, NOT per forward)
# --------------------------------------------------------------------------
def prepare_dpn_output_params(weight, bias, *, compute_dtype=None):
    """Fuse the 4x4 avg-pool scale into the linear weight and pad to a
    lane-dense 128-wide output slab.

      x_flat[n, c*16 + hw]   = x[n, c, h, w]        (NCHW reshape)
      W_fused[c*16 + hw, o]  = W[o, c] / 16
    """
    num_out, C = weight.shape
    K = C * POOL * POOL
    if compute_dtype is None:
        compute_dtype = weight.dtype
    w_fused = (jnp.repeat(weight.T, POOL * POOL, axis=0)
               * (1.0 / float(POOL * POOL))).astype(compute_dtype)      # (K, 10)
    w_pad = jnp.zeros((K, OUT_PAD), compute_dtype).at[:, :num_out].set(w_fused)
    b_pad = jnp.zeros((1, OUT_PAD), jnp.float32).at[0, :num_out].set(
        bias.astype(jnp.float32))
    return w_pad, b_pad


# --------------------------------------------------------------------------
# Forward pass (jit-friendly; all tile selection is trace-time Python)
# --------------------------------------------------------------------------
def dpn_output_forward(x_nchw, w_pad, b_pad, *, tile_n=256, k_tile=8192,
                       vmem_budget_bytes=None):
    """x_nchw: (N, C, 4, 4); w_pad: (16*C, 128); b_pad: (1, 128) -> (N, 10)."""
    N, C, H, W = x_nchw.shape
    assert H == POOL and W == POOL, "DPNOutputLayer expects a 4x4 spatial map"
    K = C * H * W
    assert w_pad.shape == (K, OUT_PAD) and b_pad.shape == (1, OUT_PAD)

    compute_dtype = w_pad.dtype
    x_item = jnp.dtype(compute_dtype).itemsize
    sub = _sublane(compute_dtype)
    if vmem_budget_bytes is None:
        vmem_budget_bytes = _default_vmem_budget()

    # Flatten NCHW -> (N, 16*C); cast only if a narrower compute dtype was chosen.
    x_flat = x_nchw.reshape(N, K).astype(compute_dtype)

    # --- batch tile: aim for >=2 tiles (keeps both v7x TensorCores busy) -----
    if N <= sub:
        tile_n_eff = N                                   # single full-extent tile
    else:
        tile_n_eff = max(sub, min(tile_n, _round_up(pl.cdiv(N, 2), sub)))

    # --- K tile: must divide K exactly (no jnp.pad copy of x; OOB K columns
    #     would otherwise poison the accumulator) -----------------------------
    k_tile_eff = _choose_k_tile(K, k_tile)

    # --- VMEM budget (per generation); weight counted twice pessimistically --
    w_bytes = K * OUT_PAD * x_item

    def working_set(tn, kt):
        return (2 * w_bytes                 # resident fused weight (pessimistic 2x)
                + 2 * OUT_PAD * 4           # bias
                + 2 * tn * kt * x_item      # double-buffered x tiles
                + 2 * tn * OUT_PAD * 4)     # double-buffered f32 output tiles

    while working_set(tile_n_eff, k_tile_eff) > vmem_budget_bytes and k_tile_eff > 128:
        new_kt = _choose_k_tile(K, k_tile_eff // 2)
        if new_kt >= k_tile_eff:
            break
        k_tile_eff = new_kt
    while (working_set(tile_n_eff, k_tile_eff) > vmem_budget_bytes
           and tile_n_eff >= 2 * sub):
        tile_n_eff = _round_up(tile_n_eff // 2, sub)

    grid = (pl.cdiv(N, tile_n_eff), K // k_tile_eff)
    vmem_limit = int(max(working_set(tile_n_eff, k_tile_eff) + (8 << 20), 24 << 20))

    out = pl.pallas_call(
        _dpn_output_kernel,
        out_shape=jax.ShapeDtypeStruct((N, OUT_PAD), jnp.float32),
        grid_spec=pltpu.PrefetchScalarGridSpec(
            num_scalar_prefetch=0,
            grid=grid,
            in_specs=[
                # x: streamed (tile_n, k_tile) blocks.
                pl.BlockSpec((tile_n_eff, k_tile_eff), lambda i, k: (i, k)),
                # fused weight: constant block index -> fetched once, resident
                # for the whole grid (no per-batch-tile re-streaming).
                pl.BlockSpec((K, OUT_PAD), lambda i, k: (0, 0)),
                # bias: tiny, constant.
                pl.BlockSpec((1, OUT_PAD), lambda i, k: (0, 0)),
            ],
            # Output block is resident across the K ("arbitrary") axis and is
            # used directly as the f32 accumulator (no VMEM scratch needed).
            out_specs=pl.BlockSpec((tile_n_eff, OUT_PAD), lambda i, k: (i, 0)),
        ),
        compiler_params=pltpu.CompilerParams(
            dimension_semantics=("parallel", "arbitrary"),
            vmem_limit_bytes=vmem_limit),
    )(x_flat, w_pad, b_pad)

    return out[:, :NUM_CLASSES].astype(x_nchw.dtype)


class DPNOutputLayerPallas:
    """Drop-in forward for the PyTorch DPNOutputLayer.

    Fused/padded parameters are prepared ONCE here (not per forward); the
    jitted per-call path only streams x and reuses the prepped weight."""

    def __init__(self, weight, bias, *, compute_dtype=None):
        self.w_pad, self.b_pad = prepare_dpn_output_params(
            weight, bias, compute_dtype=compute_dtype)
        self._fwd = jax.jit(dpn_output_forward)

    def __call__(self, x_nchw):
        return self._fwd(x_nchw, self.w_pad, self.b_pad)


if __name__ == "__main__":
    # Module config (small): C = out_planes + (num_blocks + 1) * dense_depth
    out_planes, num_blocks, dense_depth = 16, 3, 4
    C = out_planes + (num_blocks + 1) * dense_depth      # 32
    N, H, W = 2, 4, 4

    key = jax.random.PRNGKey(0)
    kx, kw, kb, kx2 = jax.random.split(key, 4)

    x = jax.random.normal(kx, (N, C, H, W), dtype=jnp.float32)
    weight = jax.random.normal(kw, (10, C), dtype=jnp.float32) / jnp.sqrt(C)
    bias = jax.random.normal(kb, (10,), dtype=jnp.float32) * 0.01

    layer = DPNOutputLayerPallas(weight, bias)           # one-time param prep
    out = jax.block_until_ready(layer(x))

    ref = jnp.mean(x.reshape(N, C, H * W), axis=-1) @ weight.T + bias
    assert out.shape == (N, 10)
    assert jnp.allclose(out, ref, atol=1e-4, rtol=1e-4), \
        float(jnp.max(jnp.abs(out - ref)))

    # Second small config: exercises >=2 batch tiles and a partial last tile.
    N2, C2 = 20, 64
    x2 = jax.random.normal(kx2, (N2, C2, 4, 4), dtype=jnp.float32)
    w2 = jax.random.normal(kw, (10, C2), dtype=jnp.float32) / jnp.sqrt(C2)
    b2 = jax.random.normal(kb, (10,), dtype=jnp.float32) * 0.01
    layer2 = DPNOutputLayerPallas(w2, b2)
    out2 = jax.block_until_ready(layer2(x2))
    ref2 = jnp.mean(x2.reshape(N2, C2, 16), axis=-1) @ w2.T + b2
    assert out2.shape == (N2, 10)
    assert jnp.allclose(out2, ref2, atol=1e-4, rtol=1e-4), \
        float(jnp.max(jnp.abs(out2 - ref2)))

    print("KERNEL_OK")
</pallas_src>

<mosaic_0001>
module attributes {stable_mosaic.version = 11 : i64} {
  func.func @_dpn_output_kernel(%arg0: i32, %arg1: i32, %arg2: memref<2x512xf32, #tpu.memory_space<vmem>>, %arg3: memref<512x128xf32, #tpu.memory_space<vmem>>, %arg4: memref<1x128xf32, #tpu.memory_space<vmem>>, %arg5: memref<2x128xf32, #tpu.memory_space<vmem>>) attributes {dimension_semantics = [#tpu.dimension_semantics<parallel>, #tpu.dimension_semantics<arbitrary>], iteration_bounds = array<i64: 1, 1>, scalar_prefetch = 0 : i64, scratch_operands = 0 : i64, tpu.core_type = #tpu.core_type<tc>, window_params = [{transform_indices = @transform_0, window_bounds = array<i64: 2, 512>}, {pipeline_mode = #tpu.pipeline_mode<synchronous>, transform_indices = @transform_1, window_bounds = array<i64: 512, 128>}, {pipeline_mode = #tpu.pipeline_mode<synchronous>, transform_indices = @transform_2, window_bounds = array<i64: 1, 128>}, {transform_indices = @transform_3, window_bounds = array<i64: 2, 128>}]} {
    %c0_i32 = arith.constant 0 : i32
    %0 = arith.cmpi eq, %arg1, %c0_i32 : i32
    %1 = arith.extui %0 : i1 to i32
    %c0_i32_0 = arith.constant 0 : i32
    %2 = arith.cmpi ne, %1, %c0_i32_0 : i32
    scf.if %2 {
      %c0_7 = arith.constant 0 : index
      %c0_8 = arith.constant 0 : index
      %12 = vector.load %arg4[%c0_7, %c0_8] : memref<1x128xf32, #tpu.memory_space<vmem>>, vector<1x128xf32>
      %13 = vector.shape_cast %12 : vector<1x128xf32> to vector<1x128xf32>
      %14 = vector.broadcast %13 : vector<1x128xf32> to vector<2x128xf32>
      %c0_9 = arith.constant 0 : index
      %c0_10 = arith.constant 0 : index
      %15 = vector.load %arg5[%c0_9, %c0_10] : memref<2x128xf32, #tpu.memory_space<vmem>>, vector<2x128xf32>
      tpu.vector_store %arg5[%c0_9, %c0_10], %14 {strides = array<i32>} : memref<2x128xf32, #tpu.memory_space<vmem>>, vector<2x128xf32>,
    } else {
    }
    %c512_i32 = arith.constant 512 : i32
    %3 = arith.muli %arg1, %c512_i32 : i32
    %4 = tpu.assume_multiple %3, 128 : i32
    %c0 = arith.constant 0 : index
    %c0_1 = arith.constant 0 : index
    %5 = vector.load %arg5[%c0, %c0_1] : memref<2x128xf32, #tpu.memory_space<vmem>>, vector<2x128xf32>
    %c0_2 = arith.constant 0 : index
    %c0_3 = arith.constant 0 : index
    %6 = vector.load %arg2[%c0_2, %c0_3] : memref<2x512xf32, #tpu.memory_space<vmem>>, vector<2x512xf32>
    %7 = arith.index_cast %4 : i32 to index
    %c0_4 = arith.constant 0 : index
    %8 = vector.load %arg3[%7, %c0_4] : memref<512x128xf32, #tpu.memory_space<vmem>>, vector<512x128xf32>
    %cst = arith.constant dense<0.000000e+00> : vector<2x128xf32>
    %9 = tpu.matmul %6, %8, %cst {dimension_numbers = #tpu.dot_dimension_numbers<[1], [0], [0], [1], [0, 0, 1, 1], [], []>} : vector<2x512xf32>, vector<512x128xf32>, vector<2x128xf32> -> vector<2x128xf32>
    %10 = arith.addf %5, %9 : vector<2x128xf32>
    %c0_5 = arith.constant 0 : index
    %c0_6 = arith.constant 0 : index
    %11 = vector.load %arg5[%c0_5, %c0_6] : memref<2x128xf32, #tpu.memory_space<vmem>>, vector<2x128xf32>
    tpu.vector_store %arg5[%c0_5, %c0_6], %10 {strides = array<i32>} : memref<2x128xf32, #tpu.memory_space<vmem>>, vector<2x128xf32>,
    return
  }
  func.func @transform_0(%arg0: i32, %arg1: i32) -> (i32, i32) {
    %c0_i32 = arith.constant 0 : i32
    return %arg0, %arg1 : i32, i32
  }
  func.func @transform_1(%arg0: i32, %arg1: i32) -> (i32, i32) {
    %c0_i32 = arith.constant 0 : i32
    %c0_i32_0 = arith.constant 0 : i32
    %c0_i32_1 = arith.constant 0 : i32
    return %c0_i32, %c0_i32_0 : i32, i32
  }
  func.func @transform_2(%arg0: i32, %arg1: i32) -> (i32, i32) {
    %c0_i32 = arith.constant 0 : i32
    %c0_i32_0 = arith.constant 0 : i32
    %c0_i32_1 = arith.constant 0 : i32
    return %c0_i32, %c0_i32_0 : i32, i32
  }
  func.func @transform_3(%arg0: i32, %arg1: i32) -> (i32, i32) {
    %c0_i32 = arith.constant 0 : i32
    %c0_i32_0 = arith.constant 0 : i32
    return %arg0, %c0_i32 : i32, i32
  }
}

</mosaic_0001>

<bundles_post_ra>
// kernel: dpn_output_forward.1
= control target key start
LH: loop header
LB: loop body
LE: loop exit
PB: predicated region body
PF: predicated region fallthrough
CT: control target
= control target key end

     0   :  { %v435_v47 = vmov 1983009808   ;;  %v100_v49 = vlaneseq  ;;  %s667_s0 = inlined_call_operand.vmem [shape: f32[2,512], index: 0, kind: input, shape index: {}]   ;;  %s668_s1 = inlined_call_operand.vmem [shape: f32[512,128], index: 1, kind: input, shape index: {}]   ;;  %s669_s2 = inlined_call_operand.vmem [shape: f32[1,128], index: 2, kind: input, shape index: {}]   ;;  %s670_s3 = inlined_call_operand.hbm [shape: f32[2,128], index: 3, kind: output, shape index: {}]  }
   0x1   :  { %v47_v0 = vld [vmem:[%s668_s1 + $0x80] sm:$0xff]  ;;  %v48_v1 = vld [vmem:[%s668_s1 + $0x88] sm:$0xff]  ;;  %v49_v11 = vld [vmem:[%s668_s1 + $0x90] sm:$0xff]  ;;  %v98_v48 = vunpack.c.l.s4 %v435_v47 }
   0x2   :  { %v79_v2 = vld [vmem:[%s668_s1 + $0x180] sm:$0xff]  ;;  %v344_v3 = vpack.c.bf16 %v48_v1, %v47_v0  ;;  %v80_v4 = vld [vmem:[%s668_s1 + $0x188] sm:$0xff]  ;;  %v50_v13 = vld [vmem:[%s668_s1 + $0x98] sm:$0xff]  ;;  %v101_v0 = vshrl.u32 %v100_v49, 7 }
   0x3   :  { %v31_v5 = vld [vmem:[%s668_s1] sm:$0xff]  ;;  %v32_v6 = vld [vmem:[%s668_s1 + $0x8] sm:$0xff]  ;;  %v376_v7 = vpack.c.bf16 %v80_v4, %v79_v2  ;;  %v81_v14 = vld [vmem:[%s668_s1 + $0x190] sm:$0xff]  ;;  %v348_v16 = vpack.c.bf16 %v50_v13, %v49_v11  ;;  %v99_v63 = vunpack.c.0.s8 %v98_v48 }
   0x4   :  { %v346_v8 = vpack.c.bf16 %v32_v6, %v31_v5  ;;  %v63_v9 = vld [vmem:[%s668_s1 + $0x100] sm:$0xff]  ;;  %v64_v10 = vld [vmem:[%s668_s1 + $0x108] sm:$0xff]  ;;  %345 = vmatprep.subr.bf16.mxu0 %v344_v3  ;;  %v82_v15 = vld [vmem:[%s668_s1 + $0x198] sm:$0xff] }
   0x5   :  { %v378_v12 = vpack.c.bf16 %v64_v10, %v63_v9  ;;  %377 = vmatprep.subr.bf16.mxu1 %v376_v7  ;;  %v380_v17 = vpack.c.bf16 %v82_v15, %v81_v14  ;;  %v33_v18 = vld [vmem:[%s668_s1 + $0x10] sm:$0xff]  ;;  %v34_v19 = vld [vmem:[%s668_s1 + $0x18] sm:$0xff]  ;;  %v51_v23 = vld [vmem:[%s668_s1 + $0xa0] sm:$0xff]  ;;  %v102_v13 = vsub.s32 %v99_v63, %v101_v0 }
   0x6   :  { %347 = vmatpush3.bf16.msra.mxu0 %v346_v8  ;;  %v65_v20 = vld [vmem:[%s668_s1 + $0x110] sm:$0xff]  ;;  %v350_v21 = vpack.c.bf16 %v34_v19, %v33_v18  ;;  %v66_v22 = vld [vmem:[%s668_s1 + $0x118] sm:$0xff]  ;;  %v52_v24 = vld [vmem:[%s668_s1 + $0xa8] sm:$0xff] }
   0x7   :  { %379 = vmatpush3.bf16.msra.mxu1 %v378_v12  ;;  %349 = vmatprep.subr.bf16.mxu0 %v348_v16  ;;  %v382_v25 = vpack.c.bf16 %v66_v22, %v65_v20  ;;  %v352_v26 = vpack.c.bf16 %v52_v24, %v51_v23  ;;  %v83_v27 = vld [vmem:[%s668_s1 + $0x1a0] sm:$0xff]  ;;  %v84_v28 = vld [vmem:[%s668_s1 + $0x1a8] sm:$0xff]  ;;  %v53_v35 = vld [vmem:[%s668_s1 + $0xb0] sm:$0xff] }
   0x8   :  { %381 = vmatprep.subr.bf16.mxu1 %v380_v17  ;;  %v35_v29 = vld [vmem:[%s668_s1 + $0x20] sm:$0xff]  ;;  %v384_v30 = vpack.c.bf16 %v84_v28, %v83_v27  ;;  %v36_v31 = vld [vmem:[%s668_s1 + $0x28] sm:$0xff]  ;;  %v54_v36 = vld [vmem:[%s668_s1 + $0xb8] sm:$0xff] }
   0x9   :  { %v67_v32 = vld [vmem:[%s668_s1 + $0x120] sm:$0xff]  ;;  %v68_v33 = vld [vmem:[%s668_s1 + $0x128] sm:$0xff]  ;;  %v354_v34 = vpack.c.bf16 %v36_v31, %v35_v29  ;;  %v85_v37 = vld [vmem:[%s668_s1 + $0x1b0] sm:$0xff]  ;;  %v356_v39 = vpack.c.bf16 %v54_v36, %v53_v35 }
   0xa   :  { %351 = vmatpush3.bf16.msra.mxu0 %v350_v21  ;;  %v386_v38 = vpack.c.bf16 %v68_v33, %v67_v32  ;;  %v86_v40 = vld [vmem:[%s668_s1 + $0x1b8] sm:$0xff]  ;;  %v37_v41 = vld [vmem:[%s668_s1 + $0x30] sm:$0xff]  ;;  %v55_v46 = vld [vmem:[%s668_s1 + $0xc0] sm:$0xff] }
   0xb   :  { %383 = vmatpush3.bf16.msra.mxu1 %v382_v25  ;;  %353 = vmatprep.subr.bf16.mxu0 %v352_v26  ;;  %v38_v42 = vld [vmem:[%s668_s1 + $0x38] sm:$0xff]  ;;  %v388_v43 = vpack.c.bf16 %v86_v40, %v85_v37  ;;  %v69_v44 = vld [vmem:[%s668_s1 + $0x130] sm:$0xff]  ;;  %v56_v50 = vld [vmem:[%s668_s1 + $0xc8] sm:$0xff] }
   0xc   :  { %385 = vmatprep.subr.bf16.mxu1 %v384_v30  ;;  %v70_v45 = vld [vmem:[%s668_s1 + $0x138] sm:$0xff]  ;;  %v87_v51 = vld [vmem:[%s668_s1 + $0x1c0] sm:$0xff]  ;;  %v88_v52 = vld [vmem:[%s668_s1 + $0x1c8] sm:$0xff]  ;;  %v358_v53 = vpack.c.bf16 %v38_v42, %v37_v41  ;;  %v360_v55 = vpack.c.bf16 %v56_v50, %v55_v46 }
   0xd   :  { %v390_v54 = vpack.c.bf16 %v70_v45, %v69_v44  ;;  %v39_v56 = vld [vmem:[%s668_s1 + $0x40] sm:$0xff]  ;;  %v40_v57 = vld [vmem:[%s668_s1 + $0x48] sm:$0xff]  ;;  %v392_v59 = vpack.c.bf16 %v88_v52, %v87_v51  ;;  %v57_v61 = vld [vmem:[%s668_s1 + $0xd0] sm:$0xff] }
   0xe   :  { %355 = vmatpush3.bf16.msra.mxu0 %v354_v34  ;;  %v71_v58 = vld [vmem:[%s668_s1 + $0x140] sm:$0xff]  ;;  %v72_v60 = vld [vmem:[%s668_s1 + $0x148] sm:$0xff]  ;;  %v58_v62 = vld [vmem:[%s668_s1 + $0xd8] sm:$0xff]  ;;  %v362_v3 = vpack.c.bf16 %v40_v57, %v39_v56 }
   0xf   :  { %387 = vmatpush3.bf16.msra.mxu1 %v386_v38  ;;  %357 = vmatprep.subr.bf16.mxu0 %v356_v39  ;;  %v89_v1 = vld [vmem:[%s668_s1 + $0x1d0] sm:$0xff]  ;;  %v90_v2 = vld [vmem:[%s668_s1 + $0x1d8] sm:$0xff]  ;;  %v394_v4 = vpack.c.bf16 %v72_v60, %v71_v58  ;;  %v364_v5 = vpack.c.bf16 %v58_v62, %v57_v61  ;;  %v59_v11 = vld [vmem:[%s668_s1 + $0xe0] sm:$0xff] }
  0x10   :  { %389 = vmatprep.subr.bf16.mxu1 %v388_v43  ;;  %v41_v6 = vld [vmem:[%s668_s1 + $0x50] sm:$0xff]  ;;  %v42_v7 = vld [vmem:[%s668_s1 + $0x58] sm:$0xff]  ;;  %v396_v9 = vpack.c.bf16 %v90_v2, %v89_v1  ;;  %v60_v12 = vld [vmem:[%s668_s1 + $0xe8] sm:$0xff] }
  0x11   :  { %v73_v8 = vld [vmem:[%s668_s1 + $0x150] sm:$0xff]  ;;  %v74_v10 = vld [vmem:[%s668_s1 + $0x158] sm:$0xff]  ;;  %v91_v14 = vld [vmem:[%s668_s1 + $0x1e0] sm:$0xff]  ;;  %v366_v16 = vpack.c.bf16 %v42_v7, %v41_v6  ;;  %v368_v20 = vpack.c.bf16 %v60_v12, %v59_v11 }
  0x12   :  { %359 = vmatpush3.bf16.msra.mxu0 %v358_v53  ;;  %v92_v15 = vld [vmem:[%s668_s1 + $0x1e8] sm:$0xff]  ;;  %v43_v17 = vld [vmem:[%s668_s1 + $0x60] sm:$0xff]  ;;  %v398_v19 = vpack.c.bf16 %v74_v10, %v73_v8 }
  0x13   :  { %391 = vmatpush3.bf16.msra.mxu1 %v390_v54  ;;  %361 = vmatprep.subr.bf16.mxu0 %v360_v55  ;;  %v44_v18 = vld [vmem:[%s668_s1 + $0x68] sm:$0xff]  ;;  %v75_v21 = vld [vmem:[%s668_s1 + $0x160] sm:$0xff] }
  0x14   :  { %393 = vmatprep.subr.bf16.mxu1 %v392_v59  ;;  %v29_v22 = vld [vmem:[%s667_s0] sm:$0xff] }
  0x16   :  { %363 = vmatpush3.bf16.msra.mxu0 %v362_v3 }
  0x17   :  { %395 = vmatpush3.bf16.msra.mxu1 %v394_v4  ;;  %365 = vmatprep.subr.bf16.mxu0 %v364_v5 }
  0x18   :  { %8 = vsyncpa [#allocation3], 0  ;;  %397 = vmatprep.subr.bf16.mxu1 %v396_v9  ;;  %v400_v23 = vpack.c.bf16 %v92_v15, %v91_v14  ;;  %v76_v24 = vld [vmem:[%s668_s1 + $0x168] sm:$0xff]  ;;  %v61_v25 = vld [vmem:[%s668_s1 + $0xf0] sm:$0xff]  ;;  %v103_v27 = vrot.slane %v29_v22, %v102_v13  ;;  %v96_v28 = vcombine.high %v29_v22, %v29_v22  ;;  %v370_v31 = vpack.c.bf16 %v44_v18, %v43_v17 }
  0x19   :  { %v62_v26 = vld [vmem:[%s668_s1 + $0xf8] sm:$0xff]  ;;  %v93_v29 = vld [vmem:[%s668_s1 + $0x1f0] sm:$0xff]  ;;  %v402_v34 = vpack.c.bf16 %v76_v24, %v75_v21  ;;  %v273_v44 = vld [vmem:[%s669_s2] ss:$0 sm:$0xff] }
  0x1a   :  { %v94_v30 = vld [vmem:[%s668_s1 + $0x1f8] sm:$0xff]  ;;  %367 = vmatpush3.bf16.msra.mxu0 %v366_v16  ;;  %v111_v32 = vcombine.high %v103_v27, %v103_v27  ;;  %v110_v33 = vrot.slane %v96_v28, %v102_v13  ;;  %v372_v35 = vpack.c.bf16 %v62_v26, %v61_v25  ;;  %v45_v36 = vld [vmem:[%s668_s1 + $0x70] sm:$0xff]  ;;  %26 = vst [vmem:[#allocation2] sm:$0x3] %v273_v44 }
  0x1b   :  { %399 = vmatpush3.bf16.msra.mxu1 %v398_v19  ;;  %369 = vmatprep.subr.bf16.mxu0 %v368_v20  ;;  %v46_v37 = vld [vmem:[%s668_s1 + $0x78] sm:$0xff]  ;;  %v404_v38 = vpack.c.bf16 %v94_v30, %v93_v29  ;;  %v77_v39 = vld [vmem:[%s668_s1 + $0x170] sm:$0xff] }
  0x1c   :  { %401 = vmatprep.subr.bf16.mxu1 %v400_v23  ;;  %v78_v40 = vld [vmem:[%s668_s1 + $0x178] sm:$0xff]  ;;  %181 = vmatprep.mubr.f32.mxu0 %v111_v32  ;;  %v112_v41 = vcombine.high %v110_v33, %v110_v33  ;;  %v374_v42 = vpack.c.bf16 %v46_v37, %v45_v36  ;;  %s436_s1 = smov [#allocation2]  }
  0x1d   :  { %v406_v43 = vpack.c.bf16 %v78_v40, %v77_v39  ;;  %s265_s8 = sshll.u32 %s436_s1, 4  ;;  %s266_s8 = int_to_ptr.vmem [resolvable:$true] %s265_s8 }
  0x1e   :  { %371 = vmatpush3.bf16.msra.mxu0 %v370_v31  ;;  %251 = vmatprep.mubr.f32.mxu1 %v112_v41  ;;  %s411_s9 = scalar_lea.vmem %s266_s8, 32  ;;  %p416_p1 = scmp.lt.s32.totalorder %s266_s8, %s266_s8 }
  0x1f   :  { %403 = vmatpush3.bf16.msra.mxu1 %v402_v34  ;;  %373 = vmatprep.subr.bf16.mxu0 %v372_v35  ;;  %p412_p0 = scmp.ne.s32.totalorder %s266_s8, %s411_s9  ;;  %p417_p2 = scmp.lt.s32.totalorder %s411_s9, %s411_s9 }
  0x20   :  { %405 = vmatprep.subr.bf16.mxu1 %v404_v38 }
  0x21   :  { %v28_v51 = vld [vmem:[#allocation2] sm:$0x3]  ;;  %p418_p3 = por %p417_p2, %p416_p1 }
  0x22   :  { %375 = vmatpush3.bf16.msra.mxu0 %v374_v42 }
  0x23   :  { %407 = vmatpush3.bf16.msra.mxu1 %v406_v43  ;;  %p419_p4 = pnand %p418_p3, %p412_p0 }
  0x25   :  { %182 = vmatmul.mubr.f32.vlgmr.msra.gmra.mrb[0].mxu0 %v103_v27 }
  0x26   :  { %252 = vmatmul.mubr.f32.vlgmr.msra.gmra.mrb[0].mxu1 %v110_v33 }
  0xf8   :  { %v306_v45 = vpop.f32.mrb[0].mxu0 }
  0xf9   :  { %v341_v46 = vpop.f32.mrb[0].mxu1  ;;  %v307_v47 = vpop.f32.mrb[1].mxu0 }
  0xfa   :  { %v308_v48 = vadd.f32 %v307_v47, %v306_v45  ;;  %v342_v49 = vpop.f32.mrb[1].mxu1 }
  0xfb   :  { %v343_v50 = vadd.f32 %v342_v49, %v341_v46 }
  0xfd   :  { %v254_v52 = vadd.f32 %v343_v50, %v308_v48 }
  0xff   :  { %v257_v53 = vadd.f32 %v254_v52, %v28_v51 }
 0x101   :  { %258 = vst [vmem:[#allocation2] sm:$0x3] %v257_v53 }
 0x102   :  { %422 = shalt.err (!%p419_p4)
}
 0x103   :  { %s423_s11 = scalar_lea.hbm %s670_s3, 32 }
 0x104   :  { %p424_p5 = scmp.ne.s32.totalorder %s670_s3, %s423_s11  ;;  %p427_p6 = scmp.lt.u32.totalorder %s423_s11, %s670_s3 }
 0x106   :  { %p429_p7 = pnand %p427_p6, %p424_p5 }
 0x108   :  { %432 = shalt.err (!%p429_p7)
}
 0x109   :  { %268 = dma.vmem_to_hbm [thread:$0]  %s266_s8, 32, %s670_s3, [#allocation3]  }
 0x10a   :  { %433 = dma.done.wait [#allocation3], 32  }
 0x10b   :  { %434 = vsyncadd [#allocation3], 4294967264 }
 0x10c   :  { %272 = vsyncpa [#allocation3], 1 }

</bundles_post_ra>
